<compile_context>
chip_gen: v7x
topology: tpu7x:2x2x1
jax: 0.10.0
libtpu: 0.0.40
codegen_flags: <defaults>
</compile_context>

<pallas_src>
import functools

import jax
import jax.numpy as jnp
from jax.experimental import pallas as pl
from jax.experimental.pallas import tpu as pltpu

LANE = 128
IN_FEATURES = 28 * 28  # 784, as implied by forward's view(-1, 28*28)


def _round_up(n, m):
    return ((n + m - 1) // m) * m


def logreg_kernel(x_ref, w_ref, b_ref, o_ref):
    # x_ref: (TB, IN) compute dtype   w_ref: (IN, C_pad) compute dtype
    # b_ref: (1, C_pad) f32           o_ref: (TB, C_pad) f32
    acc = jnp.dot(x_ref[...], w_ref[...], preferred_element_type=jnp.float32)
    o_ref[...] = (acc + b_ref[...]).astype(o_ref.dtype)


def prepare_params(weight, bias, compute_dtype=jnp.bfloat16):
    """Call-once parameter prep: transpose W and zero-pad classes to a full
    128-lane vreg. Keeps the per-call path free of transpose/pad glue."""
    num_classes, in_features = weight.shape
    c_pad = _round_up(max(num_classes, 1), LANE)
    w_t = jnp.zeros((in_features, c_pad), dtype=compute_dtype)
    w_t = w_t.at[:, :num_classes].set(weight.T.astype(compute_dtype))
    b_row = jnp.zeros((1, c_pad), dtype=jnp.float32)
    b_row = b_row.at[:, :num_classes].set(bias.astype(jnp.float32))
    return w_t, b_row, num_classes


def logistic_regression_forward(x, w_t, b_row, num_classes, block_b=512):
    """x: (..., 28, 28) or (B, 784); w_t/b_row from prepare_params()."""
    in_features, c_pad = w_t.shape
    compute_dtype = w_t.dtype

    x2d = x.reshape(-1, IN_FEATURES).astype(compute_dtype)
    assert x2d.shape[1] == in_features
    b = x2d.shape[0]

    # Batch tile: full (16,128)-aligned tiles (16-row sublane packing for bf16);
    # pad B up to a tile multiple so every grid step is full-sized.
    tb = min(block_b, _round_up(b, 16))
    b_pad = _round_up(b, tb)
    if b_pad != b:
        x2d = jnp.pad(x2d, ((0, b_pad - b), (0, 0)))

    grid = (b_pad // tb,)

    in_bytes = jnp.dtype(compute_dtype).itemsize
    cost = pl.CostEstimate(
        flops=2 * b_pad * in_features * c_pad,
        transcendentals=0,
        bytes_accessed=(b_pad * in_features * in_bytes          # x
                        + in_features * c_pad * in_bytes        # W^T
                        + c_pad * 4                             # bias
                        + b_pad * c_pad * 4),                   # out
    )

    out = pl.pallas_call(
        logreg_kernel,
        out_shape=jax.ShapeDtypeStruct((b_pad, c_pad), jnp.float32),
        grid_spec=pltpu.PrefetchScalarGridSpec(
            num_scalar_prefetch=0,
            grid=grid,
            in_specs=[
                pl.BlockSpec((tb, in_features), lambda i: (i, 0)),   # x: tiled over batch
                pl.BlockSpec((in_features, c_pad), lambda i: (0, 0)),  # W^T: resident
                pl.BlockSpec((1, c_pad), lambda i: (0, 0)),          # bias: resident
            ],
            out_specs=pl.BlockSpec((tb, c_pad), lambda i: (i, 0)),
        ),
        compiler_params=pltpu.CompilerParams(
            dimension_semantics=("parallel",),   # shard batch tiles across v7x TCs
        ),
        cost_estimate=cost,
    )(x2d, w_t, b_row)

    # Slice off batch padding and the lane padding of the class dimension.
    return out[:b, :num_classes]


if __name__ == "__main__":
    key = jax.random.PRNGKey(0)
    k_x, k_w, k_b = jax.random.split(key, 3)

    input_size = IN_FEATURES   # 784
    num_classes = 10
    batch = 8

    # Deterministic nn.Linear-style init: U(-1/sqrt(in), 1/sqrt(in))
    bound = 1.0 / jnp.sqrt(jnp.float32(input_size))
    weight = jax.random.uniform(k_w, (num_classes, input_size),
                                minval=-bound, maxval=bound, dtype=jnp.float32)
    bias = jax.random.uniform(k_b, (num_classes,),
                              minval=-bound, maxval=bound, dtype=jnp.float32)

    # Input shaped like MNIST images (B, 1, 28, 28); forward flattens it.
    x = jax.random.normal(k_x, (batch, 1, 28, 28), dtype=jnp.float32)

    # Param prep hoisted out of the per-call path.
    w_t, b_row, nc = prepare_params(weight, bias, compute_dtype=jnp.bfloat16)

    fwd = jax.jit(functools.partial(logistic_regression_forward, num_classes=nc))
    out = fwd(x, w_t, b_row)
    out = jax.block_until_ready(out)

    assert out.shape == (batch, num_classes)

    # Reference with matched precision (bf16 inputs, f32 accumulation + f32 bias).
    x2d = x.reshape(-1, IN_FEATURES)
    ref_bf16 = jnp.dot(x2d.astype(jnp.bfloat16), weight.T.astype(jnp.bfloat16),
                       preferred_element_type=jnp.float32) + bias
    assert jnp.allclose(out, ref_bf16, atol=1e-4, rtol=1e-4)

    # Sanity against full-f32 reference (bf16 read adds only tiny error).
    ref_f32 = x2d @ weight.T + bias
    assert jnp.allclose(out, ref_f32, atol=5e-2, rtol=5e-2)

    print("KERNEL_OK")
</pallas_src>

<mosaic_0001>
module attributes {stable_mosaic.version = 11 : i64} {
  func.func @logreg_kernel(%arg0: i32, %arg1: memref<16x784xbf16, #tpu.memory_space<vmem>>, %arg2: memref<784x128xbf16, #tpu.memory_space<vmem>>, %arg3: memref<1x128xf32, #tpu.memory_space<vmem>>, %arg4: memref<16x128xf32, #tpu.memory_space<vmem>>) attributes {dimension_semantics = [#tpu.dimension_semantics<parallel>], iteration_bounds = array<i64: 1>, scalar_prefetch = 0 : i64, scratch_operands = 0 : i64, tpu.core_type = #tpu.core_type<tc>, window_params = [{transform_indices = @transform_0, window_bounds = array<i64: 16, 784>}, {pipeline_mode = #tpu.pipeline_mode<synchronous>, transform_indices = @transform_1, window_bounds = array<i64: 784, 128>}, {pipeline_mode = #tpu.pipeline_mode<synchronous>, transform_indices = @transform_2, window_bounds = array<i64: 1, 128>}, {transform_indices = @transform_3, window_bounds = array<i64: 16, 128>}]} {
    %c0 = arith.constant 0 : index
    %c0_0 = arith.constant 0 : index
    %0 = vector.load %arg1[%c0, %c0_0] : memref<16x784xbf16, #tpu.memory_space<vmem>>, vector<16x784xbf16>
    %c0_1 = arith.constant 0 : index
    %c0_2 = arith.constant 0 : index
    %1 = vector.load %arg2[%c0_1, %c0_2] : memref<784x128xbf16, #tpu.memory_space<vmem>>, vector<784x128xbf16>
    %cst = arith.constant dense<0.000000e+00> : vector<16x128xf32>
    %2 = tpu.matmul %0, %1, %cst {dimension_numbers = #tpu.dot_dimension_numbers<[1], [0], [0], [1], [0, 0, 1, 1], [], []>} : vector<16x784xbf16>, vector<784x128xbf16>, vector<16x128xf32> -> vector<16x128xf32>
    %c0_3 = arith.constant 0 : index
    %c0_4 = arith.constant 0 : index
    %3 = vector.load %arg3[%c0_3, %c0_4] : memref<1x128xf32, #tpu.memory_space<vmem>>, vector<1x128xf32>
    %4 = vector.broadcast %3 : vector<1x128xf32> to vector<16x128xf32>
    %5 = arith.addf %2, %4 : vector<16x128xf32>
    %c0_5 = arith.constant 0 : index
    %c0_6 = arith.constant 0 : index
    %6 = vector.load %arg4[%c0_5, %c0_6] : memref<16x128xf32, #tpu.memory_space<vmem>>, vector<16x128xf32>
    tpu.vector_store %arg4[%c0_5, %c0_6], %5 {strides = array<i32>} : memref<16x128xf32, #tpu.memory_space<vmem>>, vector<16x128xf32>,
    return
  }
  func.func @transform_0(%arg0: i32) -> (i32, i32) {
    %c0_i32 = arith.constant 0 : i32
    %c0_i32_0 = arith.constant 0 : i32
    return %arg0, %c0_i32 : i32, i32
  }
  func.func @transform_1(%arg0: i32) -> (i32, i32) {
    %c0_i32 = arith.constant 0 : i32
    %c0_i32_0 = arith.constant 0 : i32
    %c0_i32_1 = arith.constant 0 : i32
    return %c0_i32, %c0_i32_0 : i32, i32
  }
  func.func @transform_2(%arg0: i32) -> (i32, i32) {
    %c0_i32 = arith.constant 0 : i32
    %c0_i32_0 = arith.constant 0 : i32
    %c0_i32_1 = arith.constant 0 : i32
    return %c0_i32, %c0_i32_0 : i32, i32
  }
  func.func @transform_3(%arg0: i32) -> (i32, i32) {
    %c0_i32 = arith.constant 0 : i32
    %c0_i32_0 = arith.constant 0 : i32
    return %arg0, %c0_i32 : i32, i32
  }
}

</mosaic_0001>

<bundles_post_ra>
// kernel: logistic_regression_forward.1
= control target key start
LH: loop header
LB: loop body
LE: loop exit
PB: predicated region body
PF: predicated region fallthrough
CT: control target
= control target key end

     0   :  { %v824_v38 = vmov 0.0   ;;  %vm825_vm0 = vmmov 0   ;;  %vm457_vm1 = vcmask 130048   ;;  %s1023_s1 = inlined_call_operand.vmem [shape: bf16[784,128], index: 1, kind: input, shape index: {}]   ;;  %s1024_s0 = inlined_call_operand.vmem [shape: bf16[16,784], index: 0, kind: input, shape index: {}]   ;;  %s1025_s2 = inlined_call_operand.vmem [shape: f32[1,128], index: 2, kind: input, shape index: {}]   ;;  %s1026_s3 = inlined_call_operand.vmem [shape: f32[16,128], index: 3, kind: output, shape index: {}]  }
   0x1   :  { %v765_v0 = vld [vmem:[%s1023_s1 + $0x40] sm:$0xff]   ;;  %v769_v4 = vld [vmem:[%s1023_s1 + $0x48] sm:$0xff]   ;;  %v773_v8 = vld [vmem:[%s1023_s1 + $0x50] sm:$0xff]  }
   0x2   :  { %v766_v1 = vld [vmem:[%s1023_s1] sm:$0xff]   ;;  %689 = vmatprep.subr.bf16.mxu0 %v765_v0  ;;  %v770_v5 = vld [vmem:[%s1023_s1 + $0x8] sm:$0xff]   ;;  %v774_v9 = vld [vmem:[%s1023_s1 + $0x10] sm:$0xff]  }
   0x3   :  { %v767_v2 = vld [vmem:[%s1023_s1 + $0xc0] sm:$0xff]   ;;  %690 = vmatpush3.bf16.msra.mxu0 %v766_v1  ;;  %v771_v6 = vld [vmem:[%s1023_s1 + $0xc8] sm:$0xff]   ;;  %v775_v10 = vld [vmem:[%s1023_s1 + $0xd0] sm:$0xff]  }
   0x4   :  { %v768_v3 = vld [vmem:[%s1023_s1 + $0x80] sm:$0xff]   ;;  %711 = vmatprep.subr.bf16.mxu1 %v767_v2  ;;  %691 = vmatprep.subr.bf16.mxu0 %v769_v4  ;;  %v772_v7 = vld [vmem:[%s1023_s1 + $0x88] sm:$0xff]   ;;  %v776_v11 = vld [vmem:[%s1023_s1 + $0x90] sm:$0xff]  }
   0x5   :  { %712 = vmatpush3.bf16.msra.mxu1 %v768_v3  ;;  %v777_v12 = vld [vmem:[%s1023_s1 + $0x58] sm:$0xff]   ;;  %v781_v16 = vld [vmem:[%s1023_s1 + $0x60] sm:$0xff]   ;;  %v785_v20 = vld [vmem:[%s1023_s1 + $0x68] sm:$0xff]  }
   0x6   :  { %713 = vmatprep.subr.bf16.mxu1 %v771_v6  ;;  %v778_v13 = vld [vmem:[%s1023_s1 + $0x18] sm:$0xff]   ;;  %v782_v17 = vld [vmem:[%s1023_s1 + $0x20] sm:$0xff]   ;;  %v786_v21 = vld [vmem:[%s1023_s1 + $0x28] sm:$0xff]  }
   0x7   :  { %692 = vmatpush3.bf16.msra.mxu0 %v770_v5  ;;  %v779_v14 = vld [vmem:[%s1023_s1 + $0xd8] sm:$0xff]   ;;  %v783_v18 = vld [vmem:[%s1023_s1 + $0xe0] sm:$0xff]   ;;  %v787_v22 = vld [vmem:[%s1023_s1 + $0xe8] sm:$0xff]  }
   0x8   :  { %693 = vmatprep.subr.bf16.mxu0 %v773_v8  ;;  %v780_v15 = vld [vmem:[%s1023_s1 + $0x98] sm:$0xff]   ;;  %v784_v19 = vld [vmem:[%s1023_s1 + $0xa0] sm:$0xff]   ;;  %v788_v23 = vld [vmem:[%s1023_s1 + $0xa8] sm:$0xff]  }
   0x9   :  { %714 = vmatpush3.bf16.msra.mxu1 %v772_v7  ;;  %v789_v24 = vld [vmem:[%s1023_s1 + $0x70] sm:$0xff]   ;;  %v793_v28 = vld [vmem:[%s1023_s1 + $0x78] sm:$0xff]   ;;  %v798_v32 = vld [vmem:[%s1024_s0 + $0x4] ss:$28 sps:$4 sm:$0xff]  }
   0xa   :  { %715 = vmatprep.subr.bf16.mxu1 %v775_v10  ;;  %v790_v25 = vld [vmem:[%s1023_s1 + $0x30] sm:$0xff]   ;;  %v794_v29 = vld [vmem:[%s1023_s1 + $0x38] sm:$0xff]   ;;  %493 = vmatprep.mubr.bf16.mxu0 %v798_v32  ;;  %v800_v34 = vld [vmem:[%s1023_s1 + $0x140] sm:$0xff]  }
   0xb   :  { %694 = vmatpush3.bf16.msra.mxu0 %v774_v9  ;;  %v791_v26 = vld [vmem:[%s1023_s1 + $0xf0] sm:$0xff]   ;;  %v795_v30 = vld [vmem:[%s1023_s1 + $0xf8] sm:$0xff]   ;;  %v801_v35 = vld [vmem:[%s1024_s0 + $0x8] ss:$28 sps:$4 sm:$0xff]  }
   0xc   :  { %695 = vmatprep.subr.bf16.mxu0 %v777_v12  ;;  %v792_v27 = vld [vmem:[%s1023_s1 + $0xb0] sm:$0xff]   ;;  %v796_v31 = vld [vmem:[%s1024_s0] ss:$28 sps:$4 sm:$0xff]   ;;  %v803_v36 = vld [vmem:[%s1024_s0 + $0xc] ss:$28 sps:$4 sm:$0xff]  }
   0xd   :  { %716 = vmatpush3.bf16.msra.mxu1 %v776_v11  ;;  %v799_v33 = vld [vmem:[%s1023_s1 + $0xb8] sm:$0xff]   ;;  %v804_v37 = vld [vmem:[%s1023_s1 + $0x100] sm:$0xff]   ;;  %534 = vmatprep.mubr.bf16.mxu1 %v803_v36  ;;  %v805_v39 = vld [vmem:[%s1023_s1 + $0x148] sm:$0xff]  }
   0xe   :  { %717 = vmatprep.subr.bf16.mxu1 %v779_v14  ;;  %v806_v40 = vld [vmem:[%s1023_s1 + $0x108] sm:$0xff]   ;;  %v807_v41 = vld [vmem:[%s1023_s1 + $0x150] sm:$0xff]   ;;  %v809_v43 = vld [vmem:[%s1023_s1 + $0x158] sm:$0xff]  }
   0xf   :  { %696 = vmatpush3.bf16.msra.mxu0 %v778_v13  ;;  %v808_v42 = vld [vmem:[%s1023_s1 + $0x110] sm:$0xff]   ;;  %v810_v44 = vld [vmem:[%s1023_s1 + $0x118] sm:$0xff]   ;;  %v811_v45 = vld [vmem:[%s1023_s1 + $0x160] sm:$0xff]  }
  0x10   :  { %697 = vmatprep.subr.bf16.mxu0 %v781_v16  ;;  %v812_v46 = vld [vmem:[%s1023_s1 + $0x120] sm:$0xff]   ;;  %v813_v47 = vld [vmem:[%s1023_s1 + $0x168] sm:$0xff]   ;;  %v822_v49 = vld [vmem:[%s1024_s0 + $0x14] ss:$28 sps:$4 sm:$0xff]  }
  0x11   :  { %718 = vmatpush3.bf16.msra.mxu1 %v780_v15  ;;  %v819_v48 = vld [vmem:[%s1023_s1 + $0x180] sm:$0xff]   ;;  %v823_v50 = vld [vmem:[%s1024_s0 + $0x18] ss:$28 sps:$4 sm:$0xff]   ;;  %v814_v51 = vld [vmem:[%s1023_s1 + $0x128] sm:$0xff]  }
  0x12   :  { %719 = vmatprep.subr.bf16.mxu1 %v783_v18  ;;  %v815_v52 = vld [vmem:[%s1023_s1 + $0x170] sm:$0xff]   ;;  %v817_v54 = vld [vmem:[%s1023_s1 + $0x178] sm:$0xff]   ;;  %v631_v58 = vld [vmem:[%s1025_s2] ss:$0 sm:$0xff] }
  0x13   :  { %698 = vmatpush3.bf16.msra.mxu0 %v782_v17  ;;  %v816_v53 = vld [vmem:[%s1023_s1 + $0x130] sm:$0xff]   ;;  %v818_v55 = vld [vmem:[%s1023_s1 + $0x138] sm:$0xff]  }
  0x14   :  { %699 = vmatprep.subr.bf16.mxu0 %v785_v20  ;;  %v820_v56 = vld [vmem:[%s1024_s0 + $0x10] ss:$28 sps:$4 sm:$0xff]  }
  0x15   :  { %720 = vmatpush3.bf16.msra.mxu1 %v784_v19 }
  0x16   :  { %721 = vmatprep.subr.bf16.mxu1 %v787_v22 }
  0x17   :  { %700 = vmatpush3.bf16.msra.mxu0 %v786_v21 }
  0x18   :  { %701 = vmatprep.subr.bf16.mxu0 %v789_v24 }
  0x19   :  { %722 = vmatpush3.bf16.msra.mxu1 %v788_v23 }
  0x1a   :  { %723 = vmatprep.subr.bf16.mxu1 %v791_v26 }
  0x1b   :  { %702 = vmatpush3.bf16.msra.mxu0 %v790_v25 }
  0x1c   :  { %703 = vmatprep.subr.bf16.mxu0 %v793_v28 }
  0x1d   :  { %724 = vmatpush3.bf16.msra.mxu1 %v792_v27 }
  0x1e   :  { %725 = vmatprep.subr.bf16.mxu1 %v795_v30 }
  0x1f   :  { %704 = vmatpush3.bf16.msra.mxu0 %v794_v29 }
  0x20   :  { %733 = vmatprep.subr.bf16.mxu0 %v800_v34 }
  0x21   :  { %726 = vmatpush3.bf16.msra.mxu1 %v799_v33 }
  0x22   :  { %494 = vmatmul.mubr.bf16.vlgmr.msra.gmra.mrb[0].mxu0 %v796_v31  ;;  %757 = vmatprep.subr.bf16.mxu1 %v824_v38 }
  0x23   :  { %734 = vmatpush3.bf16.msra.mxu0 %v804_v37  ;;  %575 = vmatprep.mubr.bf16.mxu0 %v822_v49 }
  0x24   :  { %535 = vmatmul.mubr.bf16.vlgmr.msra.gmra.mrb[0].mxu1 %v801_v35  ;;  %735 = vmatprep.subr.bf16.mxu0 %v805_v39 }
  0x25   :  { %759 = vmatprep.mubr.msk.bf16.mxu1 %vm825_vm0, %v824_v38  ;;  %758 = vmatpush3.bf16.msra.mxu1 %v819_v48 }
  0x27   :  { %736 = vmatpush3.bf16.msra.mxu0 %v806_v40 }
  0x28   :  { %737 = vmatprep.subr.bf16.mxu0 %v807_v41 }
  0x2b   :  { %738 = vmatpush3.bf16.msra.mxu0 %v808_v42 }
  0x2c   :  { %739 = vmatprep.subr.bf16.mxu0 %v809_v43  ;;  %760 = vmatmul.mubr.msk.bf16.vlgmr.msra.gmra.mrb[4].mxu1 %vm457_vm1, %v823_v50 }
  0x2f   :  { %740 = vmatpush3.bf16.msra.mxu0 %v810_v44 }
  0x30   :  { %741 = vmatprep.subr.bf16.mxu0 %v811_v45 }
  0x33   :  { %742 = vmatpush3.bf16.msra.mxu0 %v812_v46 }
  0x34   :  { %743 = vmatprep.subr.bf16.mxu0 %v813_v47 }
  0x37   :  { %744 = vmatpush3.bf16.msra.mxu0 %v814_v51 }
  0x38   :  { %745 = vmatprep.subr.bf16.mxu0 %v815_v52 }
  0x3b   :  { %746 = vmatpush3.bf16.msra.mxu0 %v816_v53 }
  0x3c   :  { %747 = vmatprep.subr.bf16.mxu0 %v817_v54 }
  0x3f   :  { %748 = vmatpush3.bf16.msra.mxu0 %v818_v55 }
  0x42   :  { %576 = vmatmul.mubr.bf16.vlgmr.msra.gmra.mrb[4].mxu0 %v820_v56 }
  0xf5   :  { %v705_v57 = vpop.f32.mrb[0].mxu0 }
  0xf6   :  { %v706_v59 = vpop.f32.mrb[1].mxu0 }
  0xf7   :  { %v707_v60 = vadd.f32 %v706_v59, %v705_v57  ;;  %v708_v61 = vpop.f32.mrb[2].mxu0  ;;  %v727_v62 = vpop.f32.mrb[0].mxu1 }
  0xf8   :  { %v709_v63 = vpop.f32.mrb[3].mxu0  ;;  %v728_v2 = vpop.f32.mrb[1].mxu1 }
  0xf9   :  { %v496_v0 = vadd.f32 %v707_v60, %v631_v58  ;;  %v710_v1 = vadd.f32 %v709_v63, %v708_v61  ;;  %v729_v3 = vadd.f32 %v728_v2, %v727_v62  ;;  %v730_v4 = vpop.f32.mrb[2].mxu1 }
  0xfa   :  { %v731_v6 = vpop.f32.mrb[3].mxu1 }
  0xfb   :  { %v499_v5 = vadd.f32 %v710_v1, %v631_v58  ;;  %v537_v7 = vadd.f32 %v729_v3, %v496_v0  ;;  %v732_v8 = vadd.f32 %v731_v6, %v730_v4 }
  0xfd   :  { %v540_v9 = vadd.f32 %v732_v8, %v499_v5 }
  0xff   :  { %v618_v10 = vpop.f32.mrb[4].mxu1 }
 0x100   :  { %v761_v11 = vpop.f32.mrb[5].mxu1 }
 0x101   :  { %v621_v12 = vpop.f32.mrb[6].mxu1 }
 0x102   :  { %v762_v13 = vpop.f32.mrb[7].mxu1 }
 0x115   :  { %v749_v14 = vpop.f32.mrb[4].mxu0 }
 0x116   :  { %v750_v15 = vpop.f32.mrb[5].mxu0 }
 0x117   :  { %v751_v16 = vadd.f32 %v750_v15, %v749_v14  ;;  %v752_v17 = vpop.f32.mrb[6].mxu0 }
 0x118   :  { %v753_v18 = vpop.f32.mrb[7].mxu0 }
 0x119   :  { %v578_v19 = vadd.f32 %v751_v16, %v537_v7  ;;  %v754_v20 = vadd.f32 %v753_v18, %v752_v17 }
 0x11b   :  { %v619_v21 = vadd.f32 %v618_v10, %v578_v19  ;;  %v581_v22 = vadd.f32 %v754_v20, %v540_v9 }
 0x11d   :  { %625 = vst [vmem:[%s1026_s3] sm:$0xff] %v619_v21  ;;  %v622_v23 = vadd.f32 %v621_v12, %v581_v22 }
 0x11f   :  { %626 = vst [vmem:[%s1026_s3 + $0x8] sm:$0xff] %v622_v23 }

</bundles_post_ra>
